<compile_context>
chip_gen: v7x
topology: tpu7x:2x2x1
jax: 0.10.0
libtpu: 0.0.40
codegen_flags: <defaults>
</compile_context>

<pallas_src>
import jax
import jax.numpy as jnp
from jax.experimental import pallas as pl
from jax.experimental.pallas import tpu as pltpu


def _round_up(a, b):
    return ((a + b - 1) // b) * b


def _leaky_relu(x, slope=0.01):
    # Equivalent to nn.LeakyReLU() (slope 0.01): max(x, slope*x).
    return jnp.maximum(x, slope * x)


def policy_kernel(x_ref,
                  w1_ref, b1_ref,
                  w2_ref, b2_ref,
                  w3_ref, b3_ref,
                  wh_ref, bh_ref,
                  mu_ref, sigma_ref):
    # Trunk: bf16 matmuls on the MXU, f32 accumulation, f32 elementwise.
    x = x_ref[...].astype(jnp.bfloat16)
    h = jnp.dot(x, w1_ref[...], preferred_element_type=jnp.float32) + b1_ref[...]
    h = _leaky_relu(h)
    h = jnp.dot(h.astype(jnp.bfloat16), w2_ref[...],
                preferred_element_type=jnp.float32) + b2_ref[...]
    h = _leaky_relu(h)
    h = jnp.dot(h.astype(jnp.bfloat16), w3_ref[...],
                preferred_element_type=jnp.float32) + b3_ref[...]
    h = _leaky_relu(h)

    # Fused heads: one matmul -> (TM, 2*NC_PAD); [:NC_PAD]=mu, [NC_PAD:]=log_sigma.
    head = jnp.dot(h.astype(jnp.bfloat16), wh_ref[...],
                   preferred_element_type=jnp.float32) + bh_ref[...]
    nc_pad = mu_ref.shape[-1]
    mu_ref[...] = head[:, :nc_pad].astype(mu_ref.dtype)
    sigma_ref[...] = jnp.clip(jnp.exp(head[:, nc_pad:]), 0.01, 1.0).astype(sigma_ref.dtype)


def policy_network_forward(x, params):
    """x: (B, input_dim) f32. params: dict of f32 weights/biases. Returns (mu, sigma)."""
    B, input_dim = x.shape
    hidden = params["w1"].shape[1]
    num_clients = params["wmu"].shape[1]

    # Lane-dense padded head width (outputs stored 128-lane dense, sliced in wrapper).
    NC_PAD = _round_up(num_clients, 128)

    # Batch tile: big dense tiles for real batches, minimal 8-sublane tile for tiny B.
    if B >= 256:
        TM = 256
    elif B >= 128:
        TM = 128
    else:
        TM = _round_up(B, 8)
    B_pad = _round_up(B, TM)
    grid = (B_pad // TM,)

    # Fuse mu | log_sigma into one (hidden, 2*NC_PAD) weight, zero-padded lanes.
    wh = jnp.zeros((hidden, 2 * NC_PAD), jnp.float32)
    wh = wh.at[:, :num_clients].set(params["wmu"])
    wh = wh.at[:, NC_PAD:NC_PAD + num_clients].set(params["wls"])
    bh = jnp.zeros((1, 2 * NC_PAD), jnp.float32)
    bh = bh.at[:, :num_clients].set(params["bmu"])
    bh = bh.at[:, NC_PAD:NC_PAD + num_clients].set(params["bls"])

    # bf16 weights (halve HBM traffic, native MXU path); biases stay f32 (tiny).
    w1 = params["w1"].astype(jnp.bfloat16)
    w2 = params["w2"].astype(jnp.bfloat16)
    w3 = params["w3"].astype(jnp.bfloat16)
    wh = wh.astype(jnp.bfloat16)
    b1, b2, b3 = params["b1"], params["b2"], params["b3"]

    x_pad = x if B_pad == B else jnp.pad(x, ((0, B_pad - B), (0, 0)))

    rep = lambda i: (0, 0)  # weights/biases: same block every grid step -> VMEM-resident

    mu_p, sigma_p = pl.pallas_call(
        policy_kernel,
        out_shape=(
            jax.ShapeDtypeStruct((B_pad, NC_PAD), jnp.float32),
            jax.ShapeDtypeStruct((B_pad, NC_PAD), jnp.float32),
        ),
        grid=grid,
        in_specs=[
            pl.BlockSpec((TM, input_dim), lambda i: (i, 0)),          # x tile
            pl.BlockSpec((input_dim, hidden), rep), pl.BlockSpec((1, hidden), rep),
            pl.BlockSpec((hidden, hidden), rep),    pl.BlockSpec((1, hidden), rep),
            pl.BlockSpec((hidden, hidden), rep),    pl.BlockSpec((1, hidden), rep),
            pl.BlockSpec((hidden, 2 * NC_PAD), rep), pl.BlockSpec((1, 2 * NC_PAD), rep),
        ],
        out_specs=(
            pl.BlockSpec((TM, NC_PAD), lambda i: (i, 0)),
            pl.BlockSpec((TM, NC_PAD), lambda i: (i, 0)),
        ),
        compiler_params=pltpu.CompilerParams(
            dimension_semantics=("parallel",),
        ),
    )(x_pad, w1, b1, w2, b2, w3, b3, wh, bh)

    return mu_p[:B, :num_clients], sigma_p[:B, :num_clients]


def init_params(key, input_dim, num_clients, hidden=256):
    """Deterministic synthetic init (PyTorch-like uniform fan-in scaling)."""
    def linear(key, fan_in, fan_out):
        k_w, k_b = jax.random.split(key)
        bound = 1.0 / jnp.sqrt(fan_in)
        w = jax.random.uniform(k_w, (fan_in, fan_out), jnp.float32, -bound, bound)
        b = jax.random.uniform(k_b, (1, fan_out), jnp.float32, -bound, bound)
        return w, b

    keys = jax.random.split(key, 5)
    w1, b1 = linear(keys[0], input_dim, hidden)
    w2, b2 = linear(keys[1], hidden, hidden)
    w3, b3 = linear(keys[2], hidden, hidden)
    wmu, bmu = linear(keys[3], hidden, num_clients)
    wls, bls = linear(keys[4], hidden, num_clients)
    return dict(w1=w1, b1=b1, w2=w2, b2=b2, w3=w3, b3=b3,
                wmu=wmu, bmu=bmu, wls=wls, bls=bls)


def reference_forward(x, p):
    """Pure-JAX f32 reference of the PyTorch forward for verification."""
    h = _leaky_relu(x @ p["w1"] + p["b1"])
    h = _leaky_relu(h @ p["w2"] + p["b2"])
    h = _leaky_relu(h @ p["w3"] + p["b3"])
    mu = h @ p["wmu"] + p["bmu"]
    sigma = jnp.clip(jnp.exp(h @ p["wls"] + p["bls"]), 0.01, 1.0)
    return mu, sigma


if __name__ == "__main__":
    key = jax.random.PRNGKey(0)
    k_x, k_p = jax.random.split(key)

    B, input_dim, num_clients = 2, 32, 8
    x = jax.random.normal(k_x, (B, input_dim), jnp.float32)
    params = init_params(k_p, input_dim, num_clients)

    mu, sigma = policy_network_forward(x, params)
    jax.block_until_ready((mu, sigma))

    mu_ref, sigma_ref = reference_forward(x, params)
    assert mu.shape == (B, num_clients) and sigma.shape == (B, num_clients)
    # bf16 weights in the kernel (f32 accumulation) -> loosened tolerance vs f32 ref.
    assert jnp.allclose(mu, mu_ref, atol=3e-2, rtol=3e-2)
    assert jnp.allclose(sigma, sigma_ref, atol=3e-2, rtol=3e-2)
    assert float(sigma.min()) >= 0.01 and float(sigma.max()) <= 1.0

    print("KERNEL_OK")
</pallas_src>

<mosaic_0001>
module attributes {stable_mosaic.version = 11 : i64} {
  func.func @policy_kernel(%arg0: i32, %arg1: memref<8x32xf32, #tpu.memory_space<vmem>>, %arg2: memref<32x256xbf16, #tpu.memory_space<vmem>>, %arg3: memref<1x256xf32, #tpu.memory_space<vmem>>, %arg4: memref<256x256xbf16, #tpu.memory_space<vmem>>, %arg5: memref<1x256xf32, #tpu.memory_space<vmem>>, %arg6: memref<256x256xbf16, #tpu.memory_space<vmem>>, %arg7: memref<1x256xf32, #tpu.memory_space<vmem>>, %arg8: memref<256x256xbf16, #tpu.memory_space<vmem>>, %arg9: memref<1x256xf32, #tpu.memory_space<vmem>>, %arg10: memref<8x128xf32, #tpu.memory_space<vmem>>, %arg11: memref<8x128xf32, #tpu.memory_space<vmem>>) attributes {dimension_semantics = [#tpu.dimension_semantics<parallel>], iteration_bounds = array<i64: 1>, scalar_prefetch = 0 : i64, scratch_operands = 0 : i64, tpu.core_type = #tpu.core_type<tc>, window_params = [{transform_indices = @transform_0, window_bounds = array<i64: 8, 32>}, {pipeline_mode = #tpu.pipeline_mode<synchronous>, transform_indices = @transform_1, window_bounds = array<i64: 32, 256>}, {pipeline_mode = #tpu.pipeline_mode<synchronous>, transform_indices = @transform_2, window_bounds = array<i64: 1, 256>}, {pipeline_mode = #tpu.pipeline_mode<synchronous>, transform_indices = @transform_3, window_bounds = array<i64: 256, 256>}, {pipeline_mode = #tpu.pipeline_mode<synchronous>, transform_indices = @transform_4, window_bounds = array<i64: 1, 256>}, {pipeline_mode = #tpu.pipeline_mode<synchronous>, transform_indices = @transform_5, window_bounds = array<i64: 256, 256>}, {pipeline_mode = #tpu.pipeline_mode<synchronous>, transform_indices = @transform_6, window_bounds = array<i64: 1, 256>}, {pipeline_mode = #tpu.pipeline_mode<synchronous>, transform_indices = @transform_7, window_bounds = array<i64: 256, 256>}, {pipeline_mode = #tpu.pipeline_mode<synchronous>, transform_indices = @transform_8, window_bounds = array<i64: 1, 256>}, {transform_indices = @transform_9, window_bounds = array<i64: 8, 128>}, {transform_indices = @transform_10, window_bounds = array<i64: 8, 128>}]} {
    %c0 = arith.constant 0 : index
    %c0_0 = arith.constant 0 : index
    %0 = vector.load %arg1[%c0, %c0_0] : memref<8x32xf32, #tpu.memory_space<vmem>>, vector<8x32xf32>
    %1 = arith.truncf %0 : vector<8x32xf32> to vector<8x32xbf16>
    %c0_1 = arith.constant 0 : index
    %c0_2 = arith.constant 0 : index
    %2 = vector.load %arg2[%c0_1, %c0_2] : memref<32x256xbf16, #tpu.memory_space<vmem>>, vector<32x256xbf16>
    %cst = arith.constant dense<0.000000e+00> : vector<8x256xf32>
    %3 = tpu.matmul %1, %2, %cst {dimension_numbers = #tpu.dot_dimension_numbers<[1], [0], [0], [1], [0, 0, 1, 1], [], []>} : vector<8x32xbf16>, vector<32x256xbf16>, vector<8x256xf32> -> vector<8x256xf32>
    %c0_3 = arith.constant 0 : index
    %c0_4 = arith.constant 0 : index
    %4 = vector.load %arg3[%c0_3, %c0_4] : memref<1x256xf32, #tpu.memory_space<vmem>>, vector<1x256xf32>
    %5 = vector.broadcast %4 : vector<1x256xf32> to vector<8x256xf32>
    %6 = arith.addf %3, %5 : vector<8x256xf32>
    %cst_5 = arith.constant 0.00999999977 : f32
    %7 = vector.broadcast %cst_5 : f32 to vector<8x256xf32>
    %8 = arith.mulf %7, %6 : vector<8x256xf32>
    %9 = arith.maximumf %6, %8 : vector<8x256xf32>
    %10 = arith.truncf %9 : vector<8x256xf32> to vector<8x256xbf16>
    %c0_6 = arith.constant 0 : index
    %c0_7 = arith.constant 0 : index
    %11 = vector.load %arg4[%c0_6, %c0_7] : memref<256x256xbf16, #tpu.memory_space<vmem>>, vector<256x256xbf16>
    %cst_8 = arith.constant dense<0.000000e+00> : vector<8x256xf32>
    %12 = tpu.matmul %10, %11, %cst_8 {dimension_numbers = #tpu.dot_dimension_numbers<[1], [0], [0], [1], [0, 0, 1, 1], [], []>} : vector<8x256xbf16>, vector<256x256xbf16>, vector<8x256xf32> -> vector<8x256xf32>
    %c0_9 = arith.constant 0 : index
    %c0_10 = arith.constant 0 : index
    %13 = vector.load %arg5[%c0_9, %c0_10] : memref<1x256xf32, #tpu.memory_space<vmem>>, vector<1x256xf32>
    %14 = vector.broadcast %13 : vector<1x256xf32> to vector<8x256xf32>
    %15 = arith.addf %12, %14 : vector<8x256xf32>
    %cst_11 = arith.constant 0.00999999977 : f32
    %16 = vector.broadcast %cst_11 : f32 to vector<8x256xf32>
    %17 = arith.mulf %16, %15 : vector<8x256xf32>
    %18 = arith.maximumf %15, %17 : vector<8x256xf32>
    %19 = arith.truncf %18 : vector<8x256xf32> to vector<8x256xbf16>
    %c0_12 = arith.constant 0 : index
    %c0_13 = arith.constant 0 : index
    %20 = vector.load %arg6[%c0_12, %c0_13] : memref<256x256xbf16, #tpu.memory_space<vmem>>, vector<256x256xbf16>
    %cst_14 = arith.constant dense<0.000000e+00> : vector<8x256xf32>
    %21 = tpu.matmul %19, %20, %cst_14 {dimension_numbers = #tpu.dot_dimension_numbers<[1], [0], [0], [1], [0, 0, 1, 1], [], []>} : vector<8x256xbf16>, vector<256x256xbf16>, vector<8x256xf32> -> vector<8x256xf32>
    %c0_15 = arith.constant 0 : index
    %c0_16 = arith.constant 0 : index
    %22 = vector.load %arg7[%c0_15, %c0_16] : memref<1x256xf32, #tpu.memory_space<vmem>>, vector<1x256xf32>
    %23 = vector.broadcast %22 : vector<1x256xf32> to vector<8x256xf32>
    %24 = arith.addf %21, %23 : vector<8x256xf32>
    %cst_17 = arith.constant 0.00999999977 : f32
    %25 = vector.broadcast %cst_17 : f32 to vector<8x256xf32>
    %26 = arith.mulf %25, %24 : vector<8x256xf32>
    %27 = arith.maximumf %24, %26 : vector<8x256xf32>
    %28 = arith.truncf %27 : vector<8x256xf32> to vector<8x256xbf16>
    %c0_18 = arith.constant 0 : index
    %c0_19 = arith.constant 0 : index
    %29 = vector.load %arg8[%c0_18, %c0_19] : memref<256x256xbf16, #tpu.memory_space<vmem>>, vector<256x256xbf16>
    %cst_20 = arith.constant dense<0.000000e+00> : vector<8x256xf32>
    %30 = tpu.matmul %28, %29, %cst_20 {dimension_numbers = #tpu.dot_dimension_numbers<[1], [0], [0], [1], [0, 0, 1, 1], [], []>} : vector<8x256xbf16>, vector<256x256xbf16>, vector<8x256xf32> -> vector<8x256xf32>
    %c0_21 = arith.constant 0 : index
    %c0_22 = arith.constant 0 : index
    %31 = vector.load %arg9[%c0_21, %c0_22] : memref<1x256xf32, #tpu.memory_space<vmem>>, vector<1x256xf32>
    %32 = vector.broadcast %31 : vector<1x256xf32> to vector<8x256xf32>
    %33 = arith.addf %30, %32 : vector<8x256xf32>
    %34 = vector.extract_strided_slice %33 {offsets = [0, 0], sizes = [8, 128], strides = [1, 1]} : vector<8x256xf32> to vector<8x128xf32>
    %c0_23 = arith.constant 0 : index
    %c0_24 = arith.constant 0 : index
    %35 = vector.load %arg10[%c0_23, %c0_24] : memref<8x128xf32, #tpu.memory_space<vmem>>, vector<8x128xf32>
    tpu.vector_store %arg10[%c0_23, %c0_24], %34 {strides = array<i32>} : memref<8x128xf32, #tpu.memory_space<vmem>>, vector<8x128xf32>,
    %36 = vector.extract_strided_slice %33 {offsets = [0, 128], sizes = [8, 128], strides = [1, 1]} : vector<8x256xf32> to vector<8x128xf32>
    %37 = math.exp %36 : vector<8x128xf32>
    %cst_25 = arith.constant 0.00999999977 : f32
    %cst_26 = arith.constant 1.000000e+00 : f32
    %38 = vector.broadcast %cst_25 : f32 to vector<8x128xf32>
    %39 = arith.maximumf %38, %37 : vector<8x128xf32>
    %40 = vector.broadcast %cst_26 : f32 to vector<8x128xf32>
    %41 = arith.minimumf %40, %39 : vector<8x128xf32>
    %c0_27 = arith.constant 0 : index
    %c0_28 = arith.constant 0 : index
    %42 = vector.load %arg11[%c0_27, %c0_28] : memref<8x128xf32, #tpu.memory_space<vmem>>, vector<8x128xf32>
    tpu.vector_store %arg11[%c0_27, %c0_28], %41 {strides = array<i32>} : memref<8x128xf32, #tpu.memory_space<vmem>>, vector<8x128xf32>,
    return
  }
  func.func @transform_0(%arg0: i32) -> (i32, i32) {
    %c0_i32 = arith.constant 0 : i32
    %c0_i32_0 = arith.constant 0 : i32
    return %arg0, %c0_i32 : i32, i32
  }
  func.func @transform_1(%arg0: i32) -> (i32, i32) {
    %c0_i32 = arith.constant 0 : i32
    %c0_i32_0 = arith.constant 0 : i32
    %c0_i32_1 = arith.constant 0 : i32
    return %c0_i32, %c0_i32_0 : i32, i32
  }
  func.func @transform_2(%arg0: i32) -> (i32, i32) {
    %c0_i32 = arith.constant 0 : i32
    %c0_i32_0 = arith.constant 0 : i32
    %c0_i32_1 = arith.constant 0 : i32
    return %c0_i32, %c0_i32_0 : i32, i32
  }
  func.func @transform_3(%arg0: i32) -> (i32, i32) {
    %c0_i32 = arith.constant 0 : i32
    %c0_i32_0 = arith.constant 0 : i32
    %c0_i32_1 = arith.constant 0 : i32
    return %c0_i32, %c0_i32_0 : i32, i32
  }
  func.func @transform_4(%arg0: i32) -> (i32, i32) {
    %c0_i32 = arith.constant 0 : i32
    %c0_i32_0 = arith.constant 0 : i32
    %c0_i32_1 = arith.constant 0 : i32
    return %c0_i32, %c0_i32_0 : i32, i32
  }
  func.func @transform_5(%arg0: i32) -> (i32, i32) {
    %c0_i32 = arith.constant 0 : i32
    %c0_i32_0 = arith.constant 0 : i32
    %c0_i32_1 = arith.constant 0 : i32
    return %c0_i32, %c0_i32_0 : i32, i32
  }
  func.func @transform_6(%arg0: i32) -> (i32, i32) {
    %c0_i32 = arith.constant 0 : i32
    %c0_i32_0 = arith.constant 0 : i32
    %c0_i32_1 = arith.constant 0 : i32
    return %c0_i32, %c0_i32_0 : i32, i32
  }
  func.func @transform_7(%arg0: i32) -> (i32, i32) {
    %c0_i32 = arith.constant 0 : i32
    %c0_i32_0 = arith.constant 0 : i32
    %c0_i32_1 = arith.constant 0 : i32
    return %c0_i32, %c0_i32_0 : i32, i32
  }
  func.func @transform_8(%arg0: i32) -> (i32, i32) {
    %c0_i32 = arith.constant 0 : i32
    %c0_i32_0 = arith.constant 0 : i32
    %c0_i32_1 = arith.constant 0 : i32
    return %c0_i32, %c0_i32_0 : i32, i32
  }
  func.func @transform_9(%arg0: i32) -> (i32, i32) {
    %c0_i32 = arith.constant 0 : i32
    %c0_i32_0 = arith.constant 0 : i32
    return %arg0, %c0_i32 : i32, i32
  }
  func.func @transform_10(%arg0: i32) -> (i32, i32) {
    %c0_i32 = arith.constant 0 : i32
    %c0_i32_0 = arith.constant 0 : i32
    return %arg0, %c0_i32 : i32, i32
  }
}

</mosaic_0001>

<bundles_post_ra>
// kernel: tpu_custom_call.1
= control target key start
LH: loop header
LB: loop body
LE: loop exit
PB: predicated region body
PF: predicated region fallthrough
CT: control target
= control target key end

     0   :  { %16 = vsyncpa [#allocation3], 0  ;;  %s1588_s0 = inlined_call_operand.hbm [shape: f32[8,32], index: 0, kind: input, shape index: {}]   ;;  %s1589_s1 = inlined_call_operand.hbm [shape: bf16[32,256], index: 1, kind: input, shape index: {}]   ;;  %s1590_s2 = inlined_call_operand.vmem [shape: f32[1,256], index: 2, kind: input, shape index: {}]   ;;  %s1591_s3 = inlined_call_operand.hbm [shape: bf16[256,256], index: 3, kind: input, shape index: {}]   ;;  %s1592_s4 = inlined_call_operand.vmem [shape: f32[1,256], index: 4, kind: input, shape index: {}]   ;;  %s1593_s5 = inlined_call_operand.hbm [shape: bf16[256,256], index: 5, kind: input, shape index: {}]   ;;  %s1594_s6 = inlined_call_operand.vmem [shape: f32[1,256], index: 6, kind: input, shape index: {}]   ;;  %s1595_s7 = inlined_call_operand.hbm [shape: bf16[256,256], index: 7, kind: input, shape index: {}]   ;;  %s1596_s8 = inlined_call_operand.vmem [shape: f32[1,256], index: 8, kind: input, shape index: {}]   ;;  %s1597_s9 = inlined_call_operand.hbm [shape: f32[8,128], index: 9, kind: output, shape index: {0}]   ;;  %s1598_s10 = inlined_call_operand.hbm [shape: f32[8,128], index: 10, kind: output, shape index: {1}]  }
   0x1   :  { %17 = vsyncpa [#allocation6], 0 }
   0x2   :  { %18 = vsyncpa [#allocation9], 0 }
   0x3   :  { %19 = vsyncpa [#allocation4], 0 }
   0x4   :  { %20 = vsyncpa [#allocation13], 0  ;;  %s1403_s13 = smov [#allocation5]   ;;  %s1239_s17 = scalar_lea.hbm %s1589_s1, 512 }
   0x5   :  { %s36_s14 = sshll.u32 %s1403_s13, 4  ;;  %p1240_p0 = scmp.ne.s32.totalorder %s1589_s1, %s1239_s17  ;;  %s37_s14 = int_to_ptr.vmem [resolvable:$true] %s36_s14 }
   0x6   :  { %p1243_p1 = scmp.lt.u32.totalorder %s1239_s17, %s1589_s1 }
   0x8   :  { %p1245_p2 = pnand %p1243_p1, %p1240_p0 }
   0xa   :  { %1248 = shalt.err (!%p1245_p2)
}
   0xb   :  { %s1249_s22 = scalar_lea.vmem %s37_s14, 512  ;;  %p1254_p4 = scmp.lt.s32.totalorder %s37_s14, %s37_s14 }
   0xc   :  { %p1250_p3 = scmp.ne.s32.totalorder %s37_s14, %s1249_s22  ;;  %p1255_p5 = scmp.lt.s32.totalorder %s1249_s22, %s1249_s22 }
   0xe   :  { %p1256_p6 = por %p1255_p5, %p1254_p4 }
  0x10   :  { %p1257_p7 = pnand %p1256_p6, %p1250_p3 }
  0x12   :  { %1260 = shalt.err (!%p1257_p7)
}
  0x13   :  { %s1404_s23 = smov 128   ;;  %s1405_s24 = smov 8  }
  0x14   :  { %42 = dma.hbm_to_vmem [thread:$0]  %s1589_s1, 512, %s37_s14, [#allocation6], %s1404_s23, %s1404_s23, %s1405_s24  }
  0x15   :  { %s1406_s27 = smov [#allocation8]   ;;  %s1407_s29 = smov [#allocation2]  }
  0x16   :  { %s64_s28 = sshll.u32 %s1406_s27, 4  ;;  %s27_s30 = sshll.u32 %s1407_s29, 4  ;;  %s65_s28 = int_to_ptr.vmem [resolvable:$true] %s64_s28  ;;  %s28_s30 = int_to_ptr.vmem [resolvable:$true] %s27_s30 }
  0x17   :  { %s1261_s13 = scalar_lea.hbm %s1593_s5, 4096 }
  0x18   :  { %p1262_p8 = scmp.ne.s32.totalorder %s1593_s5, %s1261_s13  ;;  %p1265_p9 = scmp.lt.u32.totalorder %s1261_s13, %s1593_s5 }
  0x1a   :  { %p1267_p10 = pnand %p1265_p9, %p1262_p8 }
  0x1c   :  { %1270 = shalt.err (!%p1267_p10)
}
  0x1d   :  { %s1271_s1 = scalar_lea.vmem %s65_s28, 4096  ;;  %p1276_p12 = scmp.lt.s32.totalorder %s65_s28, %s65_s28 }
  0x1e   :  { %p1272_p11 = scmp.ne.s32.totalorder %s65_s28, %s1271_s1  ;;  %p1277_p13 = scmp.lt.s32.totalorder %s1271_s1, %s1271_s1 }
  0x20   :  { %p1278_p0 = por %p1277_p13, %p1276_p12 }
  0x22   :  { %p1279_p1 = pnand %p1278_p0, %p1272_p11 }
  0x24   :  { %1282 = shalt.err (!%p1279_p1)
}
  0x25   :  { %70 = dma.hbm_to_vmem [thread:$0]  %s1593_s5, 4096, %s65_s28, [#allocation9], %s1404_s23, %s1404_s23, %s1405_s24  }
  0x26   :  { %s1283_s22 = scalar_lea.hbm %s1588_s0, 128 }
  0x27   :  { %p1284_p2 = scmp.ne.s32.totalorder %s1588_s0, %s1283_s22  ;;  %p1287_p3 = scmp.lt.u32.totalorder %s1283_s22, %s1588_s0 }
  0x29   :  { %p1289_p4 = pnand %p1287_p3, %p1284_p2 }
  0x2b   :  { %1292 = shalt.err (!%p1289_p4)
}
  0x2c   :  { %s1293_s11 = scalar_lea.vmem %s28_s30, 128  ;;  %p1298_p6 = scmp.lt.s32.totalorder %s28_s30, %s28_s30 }
  0x2d   :  { %p1294_p5 = scmp.ne.s32.totalorder %s28_s30, %s1293_s11  ;;  %p1299_p7 = scmp.lt.s32.totalorder %s1293_s11, %s1293_s11 }
  0x2f   :  { %p1300_p8 = por %p1299_p7, %p1298_p6 }
  0x31   :  { %p1301_p9 = pnand %p1300_p8, %p1294_p5 }
  0x33   :  { %1304 = shalt.err (!%p1301_p9)
}
  0x34   :  { %30 = dma.hbm_to_vmem [thread:$0]  %s1588_s0, 128, %s28_s30, [#allocation3]  }
  0x35   :  { %s1408_s12 = smov [#allocation7]   ;;  %s1409_s15 = smov [#allocation10]  }
  0x36   :  { %s50_s13 = sshll.u32 %s1408_s12, 4  ;;  %s78_s16 = sshll.u32 %s1409_s15, 4  ;;  %s51_s13 = int_to_ptr.vmem [resolvable:$true] %s50_s13  ;;  %s79_s16 = int_to_ptr.vmem [resolvable:$true] %s78_s16 }
  0x37   :  { %s1305_s1 = scalar_lea.hbm %s1591_s3, 4096 }
  0x38   :  { %p1306_p10 = scmp.ne.s32.totalorder %s1591_s3, %s1305_s1  ;;  %p1309_p11 = scmp.lt.u32.totalorder %s1305_s1, %s1591_s3 }
  0x3a   :  { %p1311_p12 = pnand %p1309_p11, %p1306_p10 }
  0x3c   :  { %1314 = shalt.err (!%p1311_p12)
}
  0x3d   :  { %s1315_s0 = scalar_lea.vmem %s51_s13, 4096  ;;  %p1320_p0 = scmp.lt.s32.totalorder %s51_s13, %s51_s13 }
  0x3e   :  { %p1316_p13 = scmp.ne.s32.totalorder %s51_s13, %s1315_s0  ;;  %p1321_p1 = scmp.lt.s32.totalorder %s1315_s0, %s1315_s0 }
  0x40   :  { %p1322_p2 = por %p1321_p1, %p1320_p0 }
  0x42   :  { %p1323_p3 = pnand %p1322_p2, %p1316_p13 }
  0x44   :  { %1326 = shalt.err (!%p1323_p3)
}
  0x45   :  { %56 = dma.hbm_to_vmem [thread:$0]  %s1591_s3, 4096, %s51_s13, [#allocation6], %s1404_s23, %s1404_s23, %s1405_s24  }
  0x46   :  { %s1327_s27 = scalar_lea.hbm %s1595_s7, 4096 }
  0x47   :  { %p1328_p4 = scmp.ne.s32.totalorder %s1595_s7, %s1327_s27  ;;  %p1331_p5 = scmp.lt.u32.totalorder %s1327_s27, %s1595_s7 }
  0x49   :  { %p1333_p6 = pnand %p1331_p5, %p1328_p4 }
  0x4b   :  { %1336 = shalt.err (!%p1333_p6)
}
  0x4c   :  { %s1337_s12 = scalar_lea.vmem %s79_s16, 4096  ;;  %p1342_p8 = scmp.lt.s32.totalorder %s79_s16, %s79_s16 }
  0x4d   :  { %p1338_p7 = scmp.ne.s32.totalorder %s79_s16, %s1337_s12  ;;  %p1343_p9 = scmp.lt.s32.totalorder %s1337_s12, %s1337_s12 }
  0x4f   :  { %p1344_p10 = por %p1343_p9, %p1342_p8 }
  0x51   :  { %p1345_p11 = pnand %p1344_p10, %p1338_p7 }
  0x53   :  { %1348 = shalt.err (!%p1345_p11)
}
  0x54   :  { %84 = dma.hbm_to_vmem [thread:$0]  %s1595_s7, 4096, %s79_s16, [#allocation9], %s1404_s23, %s1404_s23, %s1405_s24  }
  0x55   :  { %1393 = dma.done.wait [#allocation3], 128  }
  0x56   :  { %1394 = vsyncadd [#allocation3], 4294967168 }
  0x57   :  { %1395 = dma.done.wait [#allocation6], 4608  }
  0x58   :  { %1396 = vsyncadd [#allocation6], 4294962688 }
  0x59   :  { %1397 = dma.done.wait [#allocation9], 8192  }
  0x5a   :  { %1398 = vsyncadd [#allocation9], 4294959104  ;;  %v1410_v0 = vmov 0   ;;  %v1087_v1 = vld [vmem:[#allocation5 + $0x4] ss:$8 sps:$4 sm:$0xff]   ;;  %v103_v5 = vld [vmem:[#allocation2] sm:$0xff] }
  0x5b   :  { %177 = vmatprep.mubr.bf16.mxu0 %v1410_v0  ;;  %v1089_v2 = vld [vmem:[#allocation5] ss:$8 sps:$4 sm:$0xff]   ;;  %145 = vmatprep.subr.bf16.mxu0 %v1087_v1  ;;  %v1090_v3 = vld [vmem:[#allocation5 + $0x14] ss:$8 sps:$4 sm:$0xff]   ;;  %v1092_v4 = vld [vmem:[#allocation5 + $0x10] ss:$8 sps:$4 sm:$0xff]   ;;  %v104_v9 = vpack.c.bf16 %v103_v5, %v103_v5 }
  0x5c   :  { %146 = vmatpush1.bf16.msra.mxu0 %v1089_v2  ;;  %v1093_v6 = vld [vmem:[#allocation7 + $0x4] ss:$8 sps:$4 sm:$0xff]   ;;  %v1095_v7 = vld [vmem:[#allocation7] ss:$8 sps:$4 sm:$0xff]   ;;  %v1096_v8 = vld [vmem:[#allocation7 + $0x14] ss:$8 sps:$4 sm:$0xff]  }
  0x5d   :  { %147 = vmatprep.subr.bf16.mxu0 %v1090_v3  ;;  %396 = vmatprep.subr.bf16.mxu1 %v1093_v6  ;;  %v1098_v10 = vld [vmem:[#allocation7 + $0x10] ss:$8 sps:$4 sm:$0xff]   ;;  %vm141_vm0 = vcmask 261120   ;;  %v1099_v11 = vld [vmem:[#allocation7 + $0x24] ss:$8 sps:$4 sm:$0xff]   ;;  %v111_v3 = vlaneseq  ;;  %s1411_s17 = smov [#allocation11]  }
  0x5e   :  { %397 = vmatpush1.bf16.msra.mxu1 %v1095_v7  ;;  %v1101_v12 = vld [vmem:[#allocation7 + $0x20] ss:$8 sps:$4 sm:$0xff]   ;;  %v1102_v13 = vld [vmem:[#allocation7 + $0x34] ss:$8 sps:$4 sm:$0xff]   ;;  %v1104_v14 = vld [vmem:[#allocation7 + $0x30] ss:$8 sps:$4 sm:$0xff]  }
  0x5f   :  { %398 = vmatprep.subr.bf16.mxu1 %v1096_v8  ;;  %v1105_v15 = vld [vmem:[#allocation7 + $0x44] ss:$8 sps:$4 sm:$0xff]   ;;  %v1107_v16 = vld [vmem:[#allocation7 + $0x40] ss:$8 sps:$4 sm:$0xff]   ;;  %v1108_v17 = vld [vmem:[#allocation7 + $0x54] ss:$8 sps:$4 sm:$0xff]  }
  0x60   :  { %148 = vmatpush1.bf16.msra.mxu0 %v1092_v4  ;;  %v1110_v18 = vld [vmem:[#allocation7 + $0x50] ss:$8 sps:$4 sm:$0xff]   ;;  %v1111_v19 = vld [vmem:[#allocation7 + $0x64] ss:$8 sps:$4 sm:$0xff]   ;;  %v1113_v20 = vld [vmem:[#allocation7 + $0x60] ss:$8 sps:$4 sm:$0xff]  }
  0x61   :  { %v1114_v21 = vld [vmem:[#allocation7 + $0x74] ss:$8 sps:$4 sm:$0xff]   ;;  %v1116_v22 = vld [vmem:[#allocation7 + $0x70] ss:$8 sps:$4 sm:$0xff]   ;;  %v1117_v23 = vld [vmem:[#allocation7 + $0x84] ss:$8 sps:$4 sm:$0xff]  }
  0x62   :  { %399 = vmatpush1.bf16.msra.mxu1 %v1098_v10  ;;  %v1119_v24 = vld [vmem:[#allocation7 + $0x80] ss:$8 sps:$4 sm:$0xff]   ;;  %v1120_v25 = vld [vmem:[#allocation7 + $0x94] ss:$8 sps:$4 sm:$0xff]   ;;  %v1122_v26 = vld [vmem:[#allocation7 + $0x90] ss:$8 sps:$4 sm:$0xff]  }
  0x63   :  { %980 = vmatmul.mubr.msk.bf16.vlgmr.msra.gmra.mrb[0].mxu0 %vm141_vm0, %v104_v9  ;;  %400 = vmatprep.subr.bf16.mxu1 %v1099_v11  ;;  %v1123_v27 = vld [vmem:[#allocation7 + $0xa4] ss:$8 sps:$4 sm:$0xff]   ;;  %v1125_v28 = vld [vmem:[#allocation7 + $0xa0] ss:$8 sps:$4 sm:$0xff]   ;;  %v1126_v29 = vld [vmem:[#allocation7 + $0xb4] ss:$8 sps:$4 sm:$0xff]  }
  0x64   :  { %v1128_v30 = vld [vmem:[#allocation7 + $0xb0] ss:$8 sps:$4 sm:$0xff]   ;;  %v1129_v31 = vld [vmem:[#allocation7 + $0xc4] ss:$8 sps:$4 sm:$0xff]   ;;  %v1131_v32 = vld [vmem:[#allocation7 + $0xc0] ss:$8 sps:$4 sm:$0xff]  }
  0x65   :  { %v1132_v33 = vld [vmem:[#allocation7 + $0xd4] ss:$8 sps:$4 sm:$0xff]   ;;  %v1134_v34 = vld [vmem:[#allocation7 + $0xd0] ss:$8 sps:$4 sm:$0xff]   ;;  %v1135_v35 = vld [vmem:[#allocation7 + $0xe4] ss:$8 sps:$4 sm:$0xff]  }
  0x66   :  { %401 = vmatpush1.bf16.msra.mxu1 %v1101_v12  ;;  %v1137_v36 = vld [vmem:[#allocation7 + $0xe0] ss:$8 sps:$4 sm:$0xff]   ;;  %v1138_v37 = vld [vmem:[#allocation7 + $0xf4] ss:$8 sps:$4 sm:$0xff]   ;;  %v1140_v38 = vld [vmem:[#allocation7 + $0xf0] ss:$8 sps:$4 sm:$0xff]  }
  0x67   :  { %402 = vmatprep.subr.bf16.mxu1 %v1102_v13  ;;  %v1141_v39 = vld [vmem:[#allocation8] ss:$8 sps:$4 sm:$0xff]   ;;  %v1143_v40 = vld [vmem:[#allocation8 + $0x4] ss:$8 sps:$4 sm:$0xff]   ;;  %v1146_v41 = vld [vmem:[#allocation8 + $0x14] ss:$8 sps:$4 sm:$0xff]  }
  0x68   :  { %647 = vmatprep.subr.bf16.mxu0 %v1143_v40  ;;  %v1144_v42 = vld [vmem:[#allocation8 + $0x10] ss:$8 sps:$4 sm:$0xff]   ;;  %v1149_v43 = vld [vmem:[#allocation8 + $0x24] ss:$8 sps:$4 sm:$0xff]   ;;  %v1147_v44 = vld [vmem:[#allocation8 + $0x20] ss:$8 sps:$4 sm:$0xff]  }
  0x69   :  { %648 = vmatpush1.bf16.msra.mxu0 %v1141_v39  ;;  %v1152_v45 = vld [vmem:[#allocation8 + $0x34] ss:$8 sps:$4 sm:$0xff]   ;;  %v1150_v46 = vld [vmem:[#allocation8 + $0x30] ss:$8 sps:$4 sm:$0xff]   ;;  %v1155_v47 = vld [vmem:[#allocation8 + $0x44] ss:$8 sps:$4 sm:$0xff]  }
  0x6a   :  { %403 = vmatpush1.bf16.msra.mxu1 %v1104_v14  ;;  %649 = vmatprep.subr.bf16.mxu0 %v1146_v41  ;;  %v1153_v48 = vld [vmem:[#allocation8 + $0x40] ss:$8 sps:$4 sm:$0xff]   ;;  %v1158_v49 = vld [vmem:[#allocation8 + $0x54] ss:$8 sps:$4 sm:$0xff]   ;;  %v1156_v50 = vld [vmem:[#allocation8 + $0x50] ss:$8 sps:$4 sm:$0xff]  }
  0x6b   :  { %404 = vmatprep.subr.bf16.mxu1 %v1105_v15  ;;  %v1161_v51 = vld [vmem:[#allocation8 + $0x64] ss:$8 sps:$4 sm:$0xff]   ;;  %v1159_v52 = vld [vmem:[#allocation8 + $0x60] ss:$8 sps:$4 sm:$0xff]   ;;  %v1164_v53 = vld [vmem:[#allocation8 + $0x74] ss:$8 sps:$4 sm:$0xff]  }
  0x6c   :  { %v1162_v54 = vld [vmem:[#allocation8 + $0x70] ss:$8 sps:$4 sm:$0xff]   ;;  %v1167_v55 = vld [vmem:[#allocation8 + $0x84] ss:$8 sps:$4 sm:$0xff]   ;;  %v1165_v56 = vld [vmem:[#allocation8 + $0x80] ss:$8 sps:$4 sm:$0xff]  }
  0x6d   :  { %650 = vmatpush1.bf16.msra.mxu0 %v1144_v42  ;;  %v1170_v57 = vld [vmem:[#allocation8 + $0x94] ss:$8 sps:$4 sm:$0xff]   ;;  %v1168_v58 = vld [vmem:[#allocation8 + $0x90] ss:$8 sps:$4 sm:$0xff]   ;;  %v1173_v59 = vld [vmem:[#allocation8 + $0xa4] ss:$8 sps:$4 sm:$0xff]  }
  0x6e   :  { %405 = vmatpush1.bf16.msra.mxu1 %v1107_v16  ;;  %651 = vmatprep.subr.bf16.mxu0 %v1149_v43  ;;  %v1171_v60 = vld [vmem:[#allocation8 + $0xa0] ss:$8 sps:$4 sm:$0xff]   ;;  %v1176_v61 = vld [vmem:[#allocation8 + $0xb4] ss:$8 sps:$4 sm:$0xff]   ;;  %v1174_v62 = vld [vmem:[#allocation8 + $0xb0] ss:$8 sps:$4 sm:$0xff]  }
  0x6f   :  { %406 = vmatprep.subr.bf16.mxu1 %v1108_v17  ;;  %v1179_v63 = vld [vmem:[#allocation8 + $0xc4] ss:$8 sps:$4 sm:$0xff]   ;;  %v1177_v0 = vld [vmem:[#allocation8 + $0xc0] ss:$8 sps:$4 sm:$0xff]   ;;  %v1182_v1 = vld [vmem:[#allocation8 + $0xd4] ss:$8 sps:$4 sm:$0xff]  }
  0x70   :  { %v1180_v2 = vld [vmem:[#allocation8 + $0xd0] ss:$8 sps:$4 sm:$0xff]   ;;  %v112_v4 = vshrl.u32 %v111_v3, 7  ;;  %v1207_v39 = vld [vmem:[#allocation10 + $0x60] ss:$8 sps:$4 sm:$0xff]   ;;  %s951_s18 = sshll.u32 %s1411_s17, 4  ;;  %s952_s18 = int_to_ptr.vmem [resolvable:$true] %s951_s18 }
  0x71   :  { %652 = vmatpush1.bf16.msra.mxu0 %v1147_v44  ;;  %v109_v6 = vld [vmem:[%s1590_s2] sm:$0x3]  ;;  %v1212_v40 = vld [vmem:[#allocation10 + $0x74] ss:$8 sps:$4 sm:$0xff]   ;;  %v1215_v42 = vld [vmem:[#allocation10 + $0x84] ss:$8 sps:$4 sm:$0xff]   ;;  %p1354_p13 = scmp.lt.s32.totalorder %s952_s18, %s952_s18 }
  0x72   :  { %407 = vmatpush1.bf16.msra.mxu1 %v1110_v18  ;;  %653 = vmatprep.subr.bf16.mxu0 %v1152_v45  ;;  %v1540_v5 = vsub.s32 0, %v112_v4  ;;  %v1545_v7 = vsub.s32 1, %v112_v4  ;;  %v1210_v41 = vld [vmem:[#allocation10 + $0x70] ss:$8 sps:$4 sm:$0xff]   ;;  %v1213_v43 = vld [vmem:[#allocation10 + $0x80] ss:$8 sps:$4 sm:$0xff]  }
  0x73   :  { %408 = vmatprep.subr.bf16.mxu1 %v1111_v19  ;;  %v1218_v44 = vld [vmem:[#allocation10 + $0x94] ss:$8 sps:$4 sm:$0xff]   ;;  %v1216_v45 = vld [vmem:[#allocation10 + $0x90] ss:$8 sps:$4 sm:$0xff]   ;;  %s1349_s1 = scalar_lea.vmem %s952_s18, 128 }
  0x74   :  { %v114_v8 = vrot.slane %v109_v6, %v1540_v5  ;;  %v118_v9 = vrot.slane %v109_v6, %v1545_v7  ;;  %v1233_v6 = vld [vmem:[#allocation10 + $0xe4] ss:$8 sps:$4 sm:$0xff]   ;;  %p1350_p12 = scmp.ne.s32.totalorder %s952_s18, %s1349_s1  ;;  %p1355_p0 = scmp.lt.s32.totalorder %s1349_s1, %s1349_s1 }
  0x75   :  { %654 = vmatpush1.bf16.msra.mxu0 %v1150_v46  ;;  %v1221_v46 = vld [vmem:[#allocation10 + $0xa4] ss:$8 sps:$4 sm:$0xff]  }
  0x76   :  { %409 = vmatpush1.bf16.msra.mxu1 %v1113_v20  ;;  %655 = vmatprep.subr.bf16.mxu0 %v1155_v47  ;;  %v1219_v47 = vld [vmem:[#allocation10 + $0xa0] ss:$8 sps:$4 sm:$0xff]   ;;  %p1356_p1 = por %p1355_p0, %p1354_p13 }
  0x77   :  { %410 = vmatprep.subr.bf16.mxu1 %v1114_v21 }
  0x78   :  { %p1357_p2 = pnand %p1356_p1, %p1350_p12 }
  0x79   :  { %656 = vmatpush1.bf16.msra.mxu0 %v1153_v48  ;;  %v1224_v48 = vld [vmem:[#allocation10 + $0xb4] ss:$8 sps:$4 sm:$0xff]  }
  0x7a   :  { %411 = vmatpush1.bf16.msra.mxu1 %v1116_v22  ;;  %657 = vmatprep.subr.bf16.mxu0 %v1158_v49  ;;  %v1185_v22 = vld [vmem:[#allocation8 + $0xe4] ss:$8 sps:$4 sm:$0xff]   ;;  %v1222_v49 = vld [vmem:[#allocation10 + $0xb0] ss:$8 sps:$4 sm:$0xff]  }
  0x7b   :  { %412 = vmatprep.subr.bf16.mxu1 %v1117_v23  ;;  %v1183_v23 = vld [vmem:[#allocation8 + $0xe0] ss:$8 sps:$4 sm:$0xff]  }
  0x7d   :  { %658 = vmatpush1.bf16.msra.mxu0 %v1156_v50  ;;  %v1227_v50 = vld [vmem:[#allocation10 + $0xc4] ss:$8 sps:$4 sm:$0xff]  }
  0x7e   :  { %413 = vmatpush1.bf16.msra.mxu1 %v1119_v24  ;;  %659 = vmatprep.subr.bf16.mxu0 %v1161_v51  ;;  %v1188_v24 = vld [vmem:[#allocation8 + $0xf4] ss:$8 sps:$4 sm:$0xff]   ;;  %v1225_v51 = vld [vmem:[#allocation10 + $0xc0] ss:$8 sps:$4 sm:$0xff]  }
  0x7f   :  { %414 = vmatprep.subr.bf16.mxu1 %v1120_v25  ;;  %v1186_v25 = vld [vmem:[#allocation8 + $0xf0] ss:$8 sps:$4 sm:$0xff]  }
  0x81   :  { %660 = vmatpush1.bf16.msra.mxu0 %v1159_v52  ;;  %v1230_v52 = vld [vmem:[#allocation10 + $0xd4] ss:$8 sps:$4 sm:$0xff]  }
  0x82   :  { %415 = vmatpush1.bf16.msra.mxu1 %v1122_v26  ;;  %661 = vmatprep.subr.bf16.mxu0 %v1164_v53  ;;  %v1189_v26 = vld [vmem:[#allocation10] ss:$8 sps:$4 sm:$0xff]   ;;  %v1228_v53 = vld [vmem:[#allocation10 + $0xd0] ss:$8 sps:$4 sm:$0xff]  }
  0x83   :  { %416 = vmatprep.subr.bf16.mxu1 %v1123_v27  ;;  %v1191_v27 = vld [vmem:[#allocation10 + $0x4] ss:$8 sps:$4 sm:$0xff]  }
  0x85   :  { %662 = vmatpush1.bf16.msra.mxu0 %v1162_v54  ;;  %v224_v54 = vld [vmem:[%s1592_s4] sm:$0x3] }
  0x86   :  { %417 = vmatpush1.bf16.msra.mxu1 %v1125_v28  ;;  %663 = vmatprep.subr.bf16.mxu0 %v1167_v55  ;;  %v1194_v28 = vld [vmem:[#allocation10 + $0x14] ss:$8 sps:$4 sm:$0xff]   ;;  %v229_v55 = vrot.slane %v224_v54, %v1540_v5 }
  0x87   :  { %418 = vmatprep.subr.bf16.mxu1 %v1126_v29  ;;  %v1192_v29 = vld [vmem:[#allocation10 + $0x10] ss:$8 sps:$4 sm:$0xff]  }
  0x89   :  { %664 = vmatpush1.bf16.msra.mxu0 %v1165_v56  ;;  %v233_v56 = vrot.slane %v224_v54, %v1545_v7 }
  0x8a   :  { %419 = vmatpush1.bf16.msra.mxu1 %v1128_v30  ;;  %665 = vmatprep.subr.bf16.mxu0 %v1170_v57  ;;  %v1197_v30 = vld [vmem:[#allocation10 + $0x24] ss:$8 sps:$4 sm:$0xff]  }
  0x8b   :  { %420 = vmatprep.subr.bf16.mxu1 %v1129_v31  ;;  %v1195_v31 = vld [vmem:[#allocation10 + $0x20] ss:$8 sps:$4 sm:$0xff]  }
  0x8d   :  { %666 = vmatpush1.bf16.msra.mxu0 %v1168_v58 }
  0x8e   :  { %421 = vmatpush1.bf16.msra.mxu1 %v1131_v32  ;;  %667 = vmatprep.subr.bf16.mxu0 %v1173_v59  ;;  %v1200_v32 = vld [vmem:[#allocation10 + $0x34] ss:$8 sps:$4 sm:$0xff]  }
  0x8f   :  { %422 = vmatprep.subr.bf16.mxu1 %v1132_v33  ;;  %v1198_v33 = vld [vmem:[#allocation10 + $0x30] ss:$8 sps:$4 sm:$0xff]  }
  0x91   :  { %668 = vmatpush1.bf16.msra.mxu0 %v1171_v60 }
  0x92   :  { %423 = vmatpush1.bf16.msra.mxu1 %v1134_v34  ;;  %669 = vmatprep.subr.bf16.mxu0 %v1176_v61  ;;  %v1203_v34 = vld [vmem:[#allocation10 + $0x44] ss:$8 sps:$4 sm:$0xff]  }
  0x93   :  { %424 = vmatprep.subr.bf16.mxu1 %v1135_v35  ;;  %v1201_v35 = vld [vmem:[#allocation10 + $0x40] ss:$8 sps:$4 sm:$0xff]  }
  0x95   :  { %670 = vmatpush1.bf16.msra.mxu0 %v1174_v62 }
  0x96   :  { %425 = vmatpush1.bf16.msra.mxu1 %v1137_v36  ;;  %671 = vmatprep.subr.bf16.mxu0 %v1179_v63  ;;  %v1206_v36 = vld [vmem:[#allocation10 + $0x54] ss:$8 sps:$4 sm:$0xff]  }
  0x97   :  { %426 = vmatprep.subr.bf16.mxu1 %v1138_v37  ;;  %v1204_v37 = vld [vmem:[#allocation10 + $0x50] ss:$8 sps:$4 sm:$0xff]  }
  0x99   :  { %672 = vmatpush1.bf16.msra.mxu0 %v1177_v0 }
  0x9a   :  { %427 = vmatpush1.bf16.msra.mxu1 %v1140_v38  ;;  %673 = vmatprep.subr.bf16.mxu0 %v1182_v1  ;;  %v1209_v38 = vld [vmem:[#allocation10 + $0x64] ss:$8 sps:$4 sm:$0xff]  }
  0x9b   :  { %898 = vmatprep.subr.bf16.mxu1 %v1191_v27 }
  0x9d   :  { %674 = vmatpush1.bf16.msra.mxu0 %v1180_v2 }
  0x9e   :  { %675 = vmatprep.subr.bf16.mxu0 %v1185_v22 }
  0xa1   :  { %676 = vmatpush1.bf16.msra.mxu0 %v1183_v23 }
  0xa2   :  { %677 = vmatprep.subr.bf16.mxu0 %v1188_v24 }
  0xa5   :  { %678 = vmatpush1.bf16.msra.mxu0 %v1186_v25 }
 0x136   :  { %v179_v10 = vpop.f32.mrb[0].mxu0 }
 0x137   :  { %v180_v11 = vadd.f32 %v179_v10, %v114_v8  ;;  %v181_v12 = vpop.f32.mrb[1].mxu0  ;;  %v1231_v8 = vld [vmem:[#allocation10 + $0xe0] ss:$8 sps:$4 sm:$0xff]   ;;  %v1234_v10 = vld [vmem:[#allocation10 + $0xf0] ss:$8 sps:$4 sm:$0xff]  }
 0x138   :  { %v182_v13 = vadd.f32 %v181_v12, %v118_v9  ;;  %v183_v14 = vpop.f32.mrb[2].mxu0  ;;  %v1236_v9 = vld [vmem:[#allocation10 + $0xf4] ss:$8 sps:$4 sm:$0xff]  }
 0x139   :  { %v186_v15 = vmul.f32 0.01, %v180_v11  ;;  %v184_v16 = vpop.f32.mrb[3].mxu0 }
 0x13a   :  { %v187_v17 = vmul.f32 0.01, %v182_v13 }
 0x13b   :  { %v188_v18 = vmax.f32 %v180_v11, %v186_v15  ;;  %v475_v11 = vld [vmem:[%s1594_s6] sm:$0x3] }
 0x13c   :  { %v189_v19 = vmax.f32 %v182_v13, %v187_v17  ;;  %v480_v12 = vrot.slane %v475_v11, %v1540_v5  ;;  %v484_v13 = vrot.slane %v475_v11, %v1545_v7 }
 0x13d   :  { %v190_v21 = vpack.c.bf16 %v188_v18, %v188_v18 }
 0x13e   :  { %v191_v20 = vpack.c.bf16 %v189_v19, %v189_v19 }
 0x140   :  { %428 = vmatprep.mubr.bf16.mxu1 %v191_v20 }
 0x141   :  { %429 = vmatmul.mubr.bf16.vlgmr.msra.gmra.mrb[0].mxu1 %v190_v21 }
 0x142   :  { %899 = vmatpush1.bf16.msra.mxu1 %v1189_v26  ;;  %v726_v26 = vld [vmem:[%s1596_s8] sm:$0x3] }
 0x143   :  { %900 = vmatprep.subr.bf16.mxu1 %v1194_v28  ;;  %v731_v27 = vrot.slane %v726_v26, %v1540_v5  ;;  %v735_v28 = vrot.slane %v726_v26, %v1545_v7 }
 0x146   :  { %901 = vmatpush1.bf16.msra.mxu1 %v1192_v29 }
 0x147   :  { %902 = vmatprep.subr.bf16.mxu1 %v1197_v30 }
 0x14a   :  { %903 = vmatpush1.bf16.msra.mxu1 %v1195_v31 }
 0x14b   :  { %904 = vmatprep.subr.bf16.mxu1 %v1200_v32 }
 0x14e   :  { %905 = vmatpush1.bf16.msra.mxu1 %v1198_v33 }
 0x14f   :  { %906 = vmatprep.subr.bf16.mxu1 %v1203_v34 }
 0x152   :  { %907 = vmatpush1.bf16.msra.mxu1 %v1201_v35 }
 0x153   :  { %908 = vmatprep.subr.bf16.mxu1 %v1206_v36 }
 0x156   :  { %909 = vmatpush1.bf16.msra.mxu1 %v1204_v37 }
 0x157   :  { %910 = vmatprep.subr.bf16.mxu1 %v1209_v38 }
 0x15a   :  { %911 = vmatpush1.bf16.msra.mxu1 %v1207_v39 }
 0x15b   :  { %912 = vmatprep.subr.bf16.mxu1 %v1212_v40 }
 0x15e   :  { %913 = vmatpush1.bf16.msra.mxu1 %v1210_v41 }
 0x15f   :  { %914 = vmatprep.subr.bf16.mxu1 %v1215_v42 }
 0x162   :  { %915 = vmatpush1.bf16.msra.mxu1 %v1213_v43 }
 0x163   :  { %916 = vmatprep.subr.bf16.mxu1 %v1218_v44 }
 0x166   :  { %917 = vmatpush1.bf16.msra.mxu1 %v1216_v45 }
 0x167   :  { %918 = vmatprep.subr.bf16.mxu1 %v1221_v46 }
 0x16a   :  { %919 = vmatpush1.bf16.msra.mxu1 %v1219_v47 }
 0x16b   :  { %920 = vmatprep.subr.bf16.mxu1 %v1224_v48 }
 0x16e   :  { %921 = vmatpush1.bf16.msra.mxu1 %v1222_v49 }
 0x16f   :  { %922 = vmatprep.subr.bf16.mxu1 %v1227_v50 }
 0x172   :  { %923 = vmatpush1.bf16.msra.mxu1 %v1225_v51 }
 0x173   :  { %924 = vmatprep.subr.bf16.mxu1 %v1230_v52 }
 0x176   :  { %925 = vmatpush1.bf16.msra.mxu1 %v1228_v53 }
 0x177   :  { %926 = vmatprep.subr.bf16.mxu1 %v1233_v6 }
 0x17a   :  { %927 = vmatpush1.bf16.msra.mxu1 %v1231_v8 }
 0x17b   :  { %928 = vmatprep.subr.bf16.mxu1 %v1236_v9 }
 0x17e   :  { %929 = vmatpush1.bf16.msra.mxu1 %v1234_v10 }
 0x214   :  { %v430_v57 = vpop.f32.mrb[0].mxu1 }
 0x215   :  { %v431_v58 = vadd.f32 %v430_v57, %v229_v55  ;;  %v432_v59 = vpop.f32.mrb[1].mxu1 }
 0x216   :  { %v433_v60 = vadd.f32 %v432_v59, %v233_v56  ;;  %v434_v61 = vpop.f32.mrb[2].mxu1 }
 0x217   :  { %v437_v62 = vmul.f32 0.01, %v431_v58  ;;  %v435_v63 = vpop.f32.mrb[3].mxu1 }
 0x218   :  { %v438_v0 = vmul.f32 0.01, %v433_v60 }
 0x219   :  { %v439_v1 = vmax.f32 %v431_v58, %v437_v62 }
 0x21a   :  { %v440_v2 = vmax.f32 %v433_v60, %v438_v0 }
 0x21b   :  { %v441_v4 = vpack.c.bf16 %v439_v1, %v439_v1 }
 0x21c   :  { %v442_v3 = vpack.c.bf16 %v440_v2, %v440_v2 }
 0x21e   :  { %679 = vmatprep.mubr.bf16.mxu0 %v442_v3 }
 0x21f   :  { %680 = vmatmul.mubr.bf16.vlgmr.msra.gmra.mrb[4].mxu0 %v441_v4 }
 0x2f2   :  { %v681_v14 = vpop.f32.mrb[4].mxu0 }
 0x2f3   :  { %v682_v15 = vadd.f32 %v681_v14, %v480_v12  ;;  %v683_v16 = vpop.f32.mrb[5].mxu0 }
 0x2f4   :  { %v684_v17 = vadd.f32 %v683_v16, %v484_v13  ;;  %v685_v18 = vpop.f32.mrb[6].mxu0 }
 0x2f5   :  { %v688_v19 = vmul.f32 0.01, %v682_v15  ;;  %v686_v20 = vpop.f32.mrb[7].mxu0 }
 0x2f6   :  { %v689_v21 = vmul.f32 0.01, %v684_v17 }
 0x2f7   :  { %v690_v22 = vmax.f32 %v682_v15, %v688_v19 }
 0x2f8   :  { %v691_v23 = vmax.f32 %v684_v17, %v689_v21 }
 0x2f9   :  { %v692_v25 = vpack.c.bf16 %v690_v22, %v690_v22 }
 0x2fa   :  { %v693_v24 = vpack.c.bf16 %v691_v23, %v691_v23 }
 0x2fc   :  { %930 = vmatprep.mubr.bf16.mxu1 %v693_v24 }
 0x2fd   :  { %931 = vmatmul.mubr.bf16.vlgmr.msra.gmra.mrb[4].mxu1 %v692_v25 }
 0x3d0   :  { %v932_v29 = vpop.f32.mrb[4].mxu1 }
 0x3d1   :  { %v933_v30 = vadd.f32 %v932_v29, %v731_v27  ;;  %v934_v31 = vpop.f32.mrb[5].mxu1 }
 0x3d2   :  { %v935_v32 = vadd.f32 %v934_v31, %v735_v28  ;;  %v936_v33 = vpop.f32.mrb[6].mxu1 }
 0x3d3   :  { %939 = vst [vmem:[#allocation11] sm:$0xff] %v933_v30  ;;  %v937_v34 = vpop.f32.mrb[7].mxu1 }
 0x3d4   :  { %v940_v35 = vmul.f32 1.442695, %v935_v32 }
 0x3d5   :  { %1360 = shalt.err (!%p1357_p2)
}
 0x3d6   :  { %s1361_s19 = scalar_lea.hbm %s1597_s9, 128 }
 0x3d7   :  { %p1362_p3 = scmp.ne.s32.totalorder %s1597_s9, %s1361_s19  ;;  %p1365_p4 = scmp.lt.u32.totalorder %s1361_s19, %s1597_s9 }
 0x3d9   :  { %p1367_p5 = pnand %p1365_p4, %p1362_p3 }
 0x3db   :  { %1370 = shalt.err (!%p1367_p5)
}
 0x3dc   :  { %954 = dma.vmem_to_hbm [thread:$0]  %s952_s18, 128, %s1597_s9, [#allocation4]   ;;  %1237 = vpow2.f32 %v940_v35 }
 0x3dd   :  { %s1412_s26 = smov [#allocation12]  }
 0x3de   :  { %s961_s27 = sshll.u32 %s1412_s26, 4  ;;  %s962_s27 = int_to_ptr.vmem [resolvable:$true] %s961_s27 }
 0x3df   :  { %s1371_s29 = scalar_lea.vmem %s962_s27, 128  ;;  %p1376_p7 = scmp.lt.s32.totalorder %s962_s27, %s962_s27 }
 0x3e0   :  { %p1372_p6 = scmp.ne.s32.totalorder %s962_s27, %s1371_s29  ;;  %p1377_p8 = scmp.lt.s32.totalorder %s1371_s29, %s1371_s29 }
 0x3e2   :  { %p1378_p9 = por %p1377_p8, %p1376_p7 }
 0x3e4   :  { %p1379_p10 = pnand %p1378_p9, %p1372_p6 }
 0x3e6   :  { %v1238_v5 = vpop.eup %1237 }
 0x3e7   :  { %v942_v7 = vmax.f32 %v1238_v5, 0.01 }
 0x3e9   :  { %v943_v36 = vmin.f32 %v942_v7, 1.0 }
 0x3eb   :  { %944 = vst [vmem:[#allocation12] sm:$0xff] %v943_v36 }
 0x3ec   :  { %1382 = shalt.err (!%p1379_p10)
}
 0x3ed   :  { %s1383_s28 = scalar_lea.hbm %s1598_s10, 128 }
 0x3ee   :  { %p1384_p11 = scmp.ne.s32.totalorder %s1598_s10, %s1383_s28  ;;  %p1387_p12 = scmp.lt.u32.totalorder %s1383_s28, %s1598_s10 }
 0x3f0   :  { %p1389_p13 = pnand %p1387_p12, %p1384_p11 }
 0x3f2   :  { %1392 = shalt.err (!%p1389_p13)
}
 0x3f3   :  { %964 = dma.vmem_to_hbm [thread:$0]  %s962_s27, 128, %s1598_s10, [#allocation13]  }
 0x3f4   :  { %1399 = dma.done.wait [#allocation4], 128  }
 0x3f5   :  { %1400 = vsyncadd [#allocation4], 4294967168 }
 0x3f6   :  { %1401 = dma.done.wait [#allocation13], 128  }
 0x3f7   :  { %1402 = vsyncadd [#allocation13], 4294967168 }
 0x3f8   :  { %971 = vsyncpa [#allocation3], 1 }
 0x3f9   :  { %972 = vsyncpa [#allocation6], 1 }
 0x3fa   :  { %973 = vsyncpa [#allocation9], 1 }
 0x3fb   :  { %974 = vsyncpa [#allocation4], 1 }
 0x3fc   :  { %975 = vsyncpa [#allocation13], 1 }

</bundles_post_ra>
